<compile_context>
chip_gen: v7x
topology: tpu7x:2x2x1
jax: 0.10.0
libtpu: 0.0.40
codegen_flags: <defaults>
</compile_context>

<pallas_src>
import jax
import jax.numpy as jnp
from jax.experimental import pallas as pl
from jax.experimental.pallas import tpu as pltpu

NUM_DOMAIN = 3
OUT_PAD = 128          # lane-dense output slab width (>= NUM_DOMAIN)


def _round_up(n, m):
    return ((n + m - 1) // m) * m


def _mlp_kernel(x_ref, dom_ref, w1x_ref, w1d_ref, b1_ref,
                w2_ref, b2_ref, w3_ref, b3_ref, o_ref):
    """One batch tile of the 3-layer MLP head (dropout = identity in eval)."""
    # Layer 1: big aligned bf16 MXU dot (K = 2*hidden_dim).  The f32->bf16 cast
    # of the x tile happens here (VPU, hidden under the MXU-bound schedule).
    x_bf = x_ref[...].astype(jnp.bfloat16)
    h1 = jnp.dot(x_bf, w1x_ref[...], preferred_element_type=jnp.float32)

    # Domain contribution: three rank-1 VPU updates instead of a lane-sparse
    # K=3 f32 MXU matmul.  Exact for arbitrary domain values (one-hot here).
    dom = dom_ref[...].astype(jnp.float32)                       # (tb, 3)
    for k in range(NUM_DOMAIN):
        h1 = h1 + dom[:, k:k + 1] * w1d_ref[k:k + 1, :]
    h1 = jnp.maximum(h1 + b1_ref[...], 0.0)                      # ReLU (VPU)

    # Dropout -> identity at inference.
    h2 = jnp.dot(h1.astype(jnp.bfloat16), w2_ref[...],
                 preferred_element_type=jnp.float32) + b2_ref[...]
    h2 = jnp.maximum(h2, 0.0)                                    # ReLU (VPU)

    # Layer 3: output padded to OUT_PAD lanes (unmasked, lane-dense stores).
    h3 = jnp.dot(h2.astype(jnp.bfloat16), w3_ref[...],
                 preferred_element_type=jnp.float32) + b3_ref[...]
    o_ref[...] = h3.astype(o_ref.dtype)


def prepare_kernel_params(params):
    """Torch-layout f32 params (weights stored (in, out)) -> kernel layout:
    W1 split into x/domain parts, big weights cast to bf16, W3/b3 padded to
    OUT_PAD output lanes."""
    w1, b1, w2, b2, w3, b3 = params
    d_in = w1.shape[0]
    two_h = d_in - NUM_DOMAIN
    # Guard against a transposed / permuted checkpoint: concat order is
    # [x (2H cols), domain (3 cols)], and d1 = (2H+3-3)//2 = H.
    assert two_h > 0 and two_h % 2 == 0, "W1 must be stored (2*hidden+3, d1)"
    assert w1.shape[1] == two_h // 2, "unexpected W1 output width"
    assert w2.shape[0] == w1.shape[1] and w3.shape[0] == w2.shape[1]
    assert w3.shape[1] == NUM_DOMAIN

    w1x = w1[:two_h].astype(jnp.bfloat16)                 # (2H, d1)  big, bf16
    w1d = w1[two_h:].astype(jnp.float32)                  # (3,  d1)  tiny, f32
    w3p = jnp.zeros((w3.shape[0], OUT_PAD), jnp.bfloat16)
    w3p = w3p.at[:, :NUM_DOMAIN].set(w3.astype(jnp.bfloat16))
    b3p = jnp.zeros((1, OUT_PAD), jnp.float32)
    b3p = b3p.at[:, :NUM_DOMAIN].set(b3.astype(jnp.float32))
    return (w1x, w1d, b1.astype(jnp.float32),
            w2.astype(jnp.bfloat16), b2.astype(jnp.float32), w3p, b3p)


def domain_discriminator_forward(x, domain, kernel_params, *, block_b=512):
    """Pallas forward. x: (B, 2*hidden_dim), domain: (B, 3) int -> (B, 3) f32."""
    w1x, w1d, b1, w2, b2, w3p, b3p = kernel_params
    B, two_h = x.shape
    assert two_h == w1x.shape[0], "x width must equal 2*hidden_dim"
    assert domain.shape == (B, NUM_DOMAIN)
    d1 = w1x.shape[1]
    d2 = w2.shape[1]

    # Batch tile: multiple of 8 sublanes, capped at block_b.  For B >= 512 cap
    # it further so the grid has >= 2 steps -> ("parallel",) shards the batch
    # axis across both v7x TensorCores instead of leaving one idle.
    tb = min(block_b, _round_up(B, 8))
    if B >= 512:
        tb = min(tb, max(256, _round_up(pl.cdiv(B, 2), 8)))
    grid = (pl.cdiv(B, tb),)          # ragged last block handled by Pallas

    row_map = lambda i: (i, 0)        # batch-tiled arrays
    const_map = lambda i: (0, 0)      # weights/biases: resident across the grid

    def weight_spec(arr):
        # Constant block index -> a second pipeline buffer is pure VMEM waste.
        return pl.BlockSpec(arr.shape, const_map, pipeline_mode=pl.Buffered(1))

    n_rows = grid[0] * tb
    flops = 2 * n_rows * (two_h * d1 + NUM_DOMAIN * d1 + d1 * d2 + d2 * OUT_PAD)
    bytes_accessed = (x.size * x.dtype.itemsize
                      + domain.size * domain.dtype.itemsize
                      + w1x.size * 2 + w1d.size * 4 + b1.size * 4
                      + w2.size * 2 + b2.size * 4
                      + w3p.size * 2 + b3p.size * 4
                      + B * OUT_PAD * 2)

    out = pl.pallas_call(
        _mlp_kernel,
        out_shape=jax.ShapeDtypeStruct((B, OUT_PAD), jnp.bfloat16),
        grid=grid,
        in_specs=[
            pl.BlockSpec((tb, two_h), row_map),          # x tile (orig dtype)
            pl.BlockSpec((tb, NUM_DOMAIN), row_map),     # domain tile (int)
            weight_spec(w1x),                            # W1_x   (bf16, resident)
            weight_spec(w1d),                            # W1_dom (f32,  resident)
            weight_spec(b1),
            weight_spec(w2),
            weight_spec(b2),
            weight_spec(w3p),
            weight_spec(b3p),
        ],
        out_specs=pl.BlockSpec((tb, OUT_PAD), row_map),
        compiler_params=pltpu.CompilerParams(
            dimension_semantics=("parallel",),           # megacore on v7x
            vmem_limit_bytes=32 * 1024 * 1024),          # v5e default is 16 MiB
        cost_estimate=pl.CostEstimate(
            flops=flops, transcendentals=0, bytes_accessed=bytes_accessed),
    )(x, domain, w1x, w1d, b1, w2, b2, w3p, b3p)

    return out[:, :NUM_DOMAIN].astype(jnp.float32)


def init_params(hidden_dim, key):
    """Deterministic init mirroring nn.Linear shapes (stored transposed (in, out))."""
    d_in = hidden_dim * 2 + NUM_DOMAIN
    d1 = (d_in - NUM_DOMAIN) // 2
    d2 = (d_in - NUM_DOMAIN) // 4
    dims = [(d_in, d1), (d1, d2), (d2, NUM_DOMAIN)]
    params = []
    for fan_in, fan_out in dims:
        kw, kb, key = jax.random.split(key, 3)
        bound = 1.0 / (fan_in ** 0.5)
        w = jax.random.uniform(kw, (fan_in, fan_out), jnp.float32, -bound, bound)
        b = jax.random.uniform(kb, (1, fan_out), jnp.float32, -bound, bound)
        params += [w, b]
    return tuple(params)


def reference_forward(x, domain, params):
    """Plain-JAX f32 reference matching the PyTorch module (eval mode)."""
    w1, b1, w2, b2, w3, b3 = params
    h = jnp.concatenate([x.astype(jnp.float32), domain.astype(jnp.float32)], axis=1)
    h = jnp.maximum(h @ w1 + b1, 0.0)
    h = jnp.maximum(h @ w2 + b2, 0.0)
    return h @ w3 + b3


if __name__ == "__main__":
    key = jax.random.PRNGKey(0)
    hidden_dim = 32          # small stand-in for the default 1024
    batch = 2

    kx, kd, kp = jax.random.split(key, 3)
    x = jax.random.normal(kx, (batch, hidden_dim * 2), jnp.float32)
    domain_idx = jax.random.randint(kd, (batch,), 0, NUM_DOMAIN)
    domain = jax.nn.one_hot(domain_idx, NUM_DOMAIN, dtype=jnp.int32)

    params = init_params(hidden_dim, kp)
    kparams = prepare_kernel_params(params)

    out = domain_discriminator_forward(x, domain, kparams)
    out = jax.block_until_ready(out)

    ref = reference_forward(x, domain, params)
    assert out.shape == (batch, NUM_DOMAIN), out.shape
    # bf16 weights/activations/output with f32 accumulation -> loose tolerance.
    assert jnp.allclose(out, ref, atol=5e-2, rtol=5e-2), "mismatch vs reference"

    print("KERNEL_OK")
</pallas_src>

<mosaic_0001>
module attributes {stable_mosaic.version = 11 : i64} {
  func.func @_mlp_kernel(%arg0: i32, %arg1: memref<8x64xf32, #tpu.memory_space<vmem>>, %arg2: memref<8x3xi32, #tpu.memory_space<vmem>>, %arg3: memref<64x32xbf16, #tpu.memory_space<vmem>>, %arg4: memref<3x32xf32, #tpu.memory_space<vmem>>, %arg5: memref<1x32xf32, #tpu.memory_space<vmem>>, %arg6: memref<32x16xbf16, #tpu.memory_space<vmem>>, %arg7: memref<1x16xf32, #tpu.memory_space<vmem>>, %arg8: memref<16x128xbf16, #tpu.memory_space<vmem>>, %arg9: memref<1x128xf32, #tpu.memory_space<vmem>>, %arg10: memref<8x128xbf16, #tpu.memory_space<vmem>>) attributes {dimension_semantics = [#tpu.dimension_semantics<parallel>], iteration_bounds = array<i64: 1>, scalar_prefetch = 0 : i64, scratch_operands = 0 : i64, tpu.core_type = #tpu.core_type<tc>, window_params = [{transform_indices = @transform_0, window_bounds = array<i64: 8, 64>}, {transform_indices = @transform_1, window_bounds = array<i64: 8, 3>}, {pipeline_mode = #tpu.pipeline_mode<synchronous>, transform_indices = @transform_2, window_bounds = array<i64: 64, 32>}, {pipeline_mode = #tpu.pipeline_mode<synchronous>, transform_indices = @transform_3, window_bounds = array<i64: 3, 32>}, {pipeline_mode = #tpu.pipeline_mode<synchronous>, transform_indices = @transform_4, window_bounds = array<i64: 1, 32>}, {pipeline_mode = #tpu.pipeline_mode<synchronous>, transform_indices = @transform_5, window_bounds = array<i64: 32, 16>}, {pipeline_mode = #tpu.pipeline_mode<synchronous>, transform_indices = @transform_6, window_bounds = array<i64: 1, 16>}, {pipeline_mode = #tpu.pipeline_mode<synchronous>, transform_indices = @transform_7, window_bounds = array<i64: 16, 128>}, {pipeline_mode = #tpu.pipeline_mode<synchronous>, transform_indices = @transform_8, window_bounds = array<i64: 1, 128>}, {transform_indices = @transform_9, window_bounds = array<i64: 8, 128>}]} {
    %c0 = arith.constant 0 : index
    %c0_0 = arith.constant 0 : index
    %0 = vector.load %arg1[%c0, %c0_0] : memref<8x64xf32, #tpu.memory_space<vmem>>, vector<8x64xf32>
    %1 = arith.truncf %0 : vector<8x64xf32> to vector<8x64xbf16>
    %c0_1 = arith.constant 0 : index
    %c0_2 = arith.constant 0 : index
    %2 = vector.load %arg3[%c0_1, %c0_2] : memref<64x32xbf16, #tpu.memory_space<vmem>>, vector<64x32xbf16>
    %cst = arith.constant dense<0.000000e+00> : vector<8x32xf32>
    %3 = tpu.matmul %1, %2, %cst {dimension_numbers = #tpu.dot_dimension_numbers<[1], [0], [0], [1], [0, 0, 1, 1], [], []>} : vector<8x64xbf16>, vector<64x32xbf16>, vector<8x32xf32> -> vector<8x32xf32>
    %c0_3 = arith.constant 0 : index
    %c0_4 = arith.constant 0 : index
    %4 = vector.load %arg2[%c0_3, %c0_4] : memref<8x3xi32, #tpu.memory_space<vmem>>, vector<8x3xi32>
    %5 = arith.sitofp %4 : vector<8x3xi32> to vector<8x3xf32>
    %6 = vector.extract_strided_slice %5 {offsets = [0, 0], sizes = [8, 1], strides = [1, 1]} : vector<8x3xf32> to vector<8x1xf32>
    %c0_5 = arith.constant 0 : index
    %c0_6 = arith.constant 0 : index
    %7 = vector.load %arg4[%c0_5, %c0_6] : memref<3x32xf32, #tpu.memory_space<vmem>>, vector<1x32xf32>
    %8 = vector.broadcast %6 : vector<8x1xf32> to vector<8x32xf32>
    %9 = vector.broadcast %7 : vector<1x32xf32> to vector<8x32xf32>
    %10 = arith.mulf %8, %9 : vector<8x32xf32>
    %11 = arith.addf %3, %10 : vector<8x32xf32>
    %12 = vector.extract_strided_slice %5 {offsets = [0, 1], sizes = [8, 1], strides = [1, 1]} : vector<8x3xf32> to vector<8x1xf32>
    %c1 = arith.constant 1 : index
    %c0_7 = arith.constant 0 : index
    %13 = vector.load %arg4[%c1, %c0_7] : memref<3x32xf32, #tpu.memory_space<vmem>>, vector<1x32xf32>
    %14 = vector.broadcast %12 : vector<8x1xf32> to vector<8x32xf32>
    %15 = vector.broadcast %13 : vector<1x32xf32> to vector<8x32xf32>
    %16 = arith.mulf %14, %15 : vector<8x32xf32>
    %17 = arith.addf %11, %16 : vector<8x32xf32>
    %18 = vector.extract_strided_slice %5 {offsets = [0, 2], sizes = [8, 1], strides = [1, 1]} : vector<8x3xf32> to vector<8x1xf32>
    %c2 = arith.constant 2 : index
    %c0_8 = arith.constant 0 : index
    %19 = vector.load %arg4[%c2, %c0_8] : memref<3x32xf32, #tpu.memory_space<vmem>>, vector<1x32xf32>
    %20 = vector.broadcast %18 : vector<8x1xf32> to vector<8x32xf32>
    %21 = vector.broadcast %19 : vector<1x32xf32> to vector<8x32xf32>
    %22 = arith.mulf %20, %21 : vector<8x32xf32>
    %23 = arith.addf %17, %22 : vector<8x32xf32>
    %c0_9 = arith.constant 0 : index
    %c0_10 = arith.constant 0 : index
    %24 = vector.load %arg5[%c0_9, %c0_10] : memref<1x32xf32, #tpu.memory_space<vmem>>, vector<1x32xf32>
    %25 = vector.broadcast %24 : vector<1x32xf32> to vector<8x32xf32>
    %26 = arith.addf %23, %25 : vector<8x32xf32>
    %cst_11 = arith.constant 0.000000e+00 : f32
    %27 = vector.broadcast %cst_11 : f32 to vector<8x32xf32>
    %28 = arith.maximumf %26, %27 : vector<8x32xf32>
    %29 = arith.truncf %28 : vector<8x32xf32> to vector<8x32xbf16>
    %c0_12 = arith.constant 0 : index
    %c0_13 = arith.constant 0 : index
    %30 = vector.load %arg6[%c0_12, %c0_13] : memref<32x16xbf16, #tpu.memory_space<vmem>>, vector<32x16xbf16>
    %cst_14 = arith.constant dense<0.000000e+00> : vector<8x16xf32>
    %31 = tpu.matmul %29, %30, %cst_14 {dimension_numbers = #tpu.dot_dimension_numbers<[1], [0], [0], [1], [0, 0, 1, 1], [], []>} : vector<8x32xbf16>, vector<32x16xbf16>, vector<8x16xf32> -> vector<8x16xf32>
    %c0_15 = arith.constant 0 : index
    %c0_16 = arith.constant 0 : index
    %32 = vector.load %arg7[%c0_15, %c0_16] : memref<1x16xf32, #tpu.memory_space<vmem>>, vector<1x16xf32>
    %33 = vector.broadcast %32 : vector<1x16xf32> to vector<8x16xf32>
    %34 = arith.addf %31, %33 : vector<8x16xf32>
    %cst_17 = arith.constant 0.000000e+00 : f32
    %35 = vector.broadcast %cst_17 : f32 to vector<8x16xf32>
    %36 = arith.maximumf %34, %35 : vector<8x16xf32>
    %37 = arith.truncf %36 : vector<8x16xf32> to vector<8x16xbf16>
    %c0_18 = arith.constant 0 : index
    %c0_19 = arith.constant 0 : index
    %38 = vector.load %arg8[%c0_18, %c0_19] : memref<16x128xbf16, #tpu.memory_space<vmem>>, vector<16x128xbf16>
    %cst_20 = arith.constant dense<0.000000e+00> : vector<8x128xf32>
    %39 = tpu.matmul %37, %38, %cst_20 {dimension_numbers = #tpu.dot_dimension_numbers<[1], [0], [0], [1], [0, 0, 1, 1], [], []>} : vector<8x16xbf16>, vector<16x128xbf16>, vector<8x128xf32> -> vector<8x128xf32>
    %c0_21 = arith.constant 0 : index
    %c0_22 = arith.constant 0 : index
    %40 = vector.load %arg9[%c0_21, %c0_22] : memref<1x128xf32, #tpu.memory_space<vmem>>, vector<1x128xf32>
    %41 = vector.broadcast %40 : vector<1x128xf32> to vector<8x128xf32>
    %42 = arith.addf %39, %41 : vector<8x128xf32>
    %43 = arith.truncf %42 : vector<8x128xf32> to vector<8x128xbf16>
    %c0_23 = arith.constant 0 : index
    %c0_24 = arith.constant 0 : index
    %44 = vector.load %arg10[%c0_23, %c0_24] : memref<8x128xbf16, #tpu.memory_space<vmem>>, vector<8x128xbf16>
    tpu.vector_store %arg10[%c0_23, %c0_24], %43 {strides = array<i32>} : memref<8x128xbf16, #tpu.memory_space<vmem>>, vector<8x128xbf16>,
    return
  }
  func.func @transform_0(%arg0: i32) -> (i32, i32) {
    %c0_i32 = arith.constant 0 : i32
    %c0_i32_0 = arith.constant 0 : i32
    return %arg0, %c0_i32 : i32, i32
  }
  func.func @transform_1(%arg0: i32) -> (i32, i32) {
    %c0_i32 = arith.constant 0 : i32
    %c0_i32_0 = arith.constant 0 : i32
    return %arg0, %c0_i32 : i32, i32
  }
  func.func @transform_2(%arg0: i32) -> (i32, i32) {
    %c0_i32 = arith.constant 0 : i32
    %c0_i32_0 = arith.constant 0 : i32
    %c0_i32_1 = arith.constant 0 : i32
    return %c0_i32, %c0_i32_0 : i32, i32
  }
  func.func @transform_3(%arg0: i32) -> (i32, i32) {
    %c0_i32 = arith.constant 0 : i32
    %c0_i32_0 = arith.constant 0 : i32
    %c0_i32_1 = arith.constant 0 : i32
    return %c0_i32, %c0_i32_0 : i32, i32
  }
  func.func @transform_4(%arg0: i32) -> (i32, i32) {
    %c0_i32 = arith.constant 0 : i32
    %c0_i32_0 = arith.constant 0 : i32
    %c0_i32_1 = arith.constant 0 : i32
    return %c0_i32, %c0_i32_0 : i32, i32
  }
  func.func @transform_5(%arg0: i32) -> (i32, i32) {
    %c0_i32 = arith.constant 0 : i32
    %c0_i32_0 = arith.constant 0 : i32
    %c0_i32_1 = arith.constant 0 : i32
    return %c0_i32, %c0_i32_0 : i32, i32
  }
  func.func @transform_6(%arg0: i32) -> (i32, i32) {
    %c0_i32 = arith.constant 0 : i32
    %c0_i32_0 = arith.constant 0 : i32
    %c0_i32_1 = arith.constant 0 : i32
    return %c0_i32, %c0_i32_0 : i32, i32
  }
  func.func @transform_7(%arg0: i32) -> (i32, i32) {
    %c0_i32 = arith.constant 0 : i32
    %c0_i32_0 = arith.constant 0 : i32
    %c0_i32_1 = arith.constant 0 : i32
    return %c0_i32, %c0_i32_0 : i32, i32
  }
  func.func @transform_8(%arg0: i32) -> (i32, i32) {
    %c0_i32 = arith.constant 0 : i32
    %c0_i32_0 = arith.constant 0 : i32
    %c0_i32_1 = arith.constant 0 : i32
    return %c0_i32, %c0_i32_0 : i32, i32
  }
  func.func @transform_9(%arg0: i32) -> (i32, i32) {
    %c0_i32 = arith.constant 0 : i32
    %c0_i32_0 = arith.constant 0 : i32
    return %arg0, %c0_i32 : i32, i32
  }
}

</mosaic_0001>

<bundles_post_ra>
// kernel: tpu_custom_call.1
= control target key start
LH: loop header
LB: loop body
LE: loop exit
PB: predicated region body
PF: predicated region fallthrough
CT: control target
= control target key end

     0   :  { %14 = vsyncpa [#allocation3], 0  ;;  %v433_v1 = vmov 0.0   ;;  %vm434_vm0 = vmmov 0   ;;  %v435_v5 = vmov 0   ;;  %v436_v7 = vmov 2   ;;  %s552_s0 = inlined_call_operand.vmem [shape: f32[2,64], index: 0, kind: input, shape index: {}]   ;;  %s553_s1 = inlined_call_operand.vmem [shape: s32[2,3], index: 1, kind: input, shape index: {}]   ;;  %s554_s2 = inlined_call_operand.vmem [shape: bf16[64,32], index: 2, kind: input, shape index: {}]   ;;  %s555_s3 = inlined_call_operand.vmem [shape: f32[3,32], index: 3, kind: input, shape index: {}]   ;;  %s556_s4 = inlined_call_operand.vmem [shape: f32[1,32], index: 4, kind: input, shape index: {}]   ;;  %s557_s5 = inlined_call_operand.vmem [shape: bf16[32,16], index: 5, kind: input, shape index: {}]   ;;  %s558_s6 = inlined_call_operand.vmem [shape: f32[1,16], index: 6, kind: input, shape index: {}]   ;;  %s559_s7 = inlined_call_operand.vmem [shape: bf16[16,128], index: 7, kind: input, shape index: {}]   ;;  %s560_s8 = inlined_call_operand.vmem [shape: f32[1,128], index: 8, kind: input, shape index: {}]   ;;  %s561_s9 = inlined_call_operand.hbm [shape: bf16[2,128], index: 9, kind: output, shape index: {}]  }
   0x1   :  { %v402_v0 = vld [vmem:[%s554_s2] sm:$0xff]   ;;  %363 = vmatprep.subr.bf16.mxu0 %v433_v1  ;;  %375 = vmatprep.subr.bf16.mxu1 %v433_v1  ;;  %v403_v2 = vld [vmem:[%s554_s2 + $0x8] sm:$0xff]   ;;  %v404_v4 = vld [vmem:[%s554_s2 + $0x10] sm:$0xff]   ;;  %v437_v10 = vmov 1   ;;  %vm81_vm1 = vcmask 523264   ;;  %vm180_vm2 = vcmask 261120   ;;  %v290_v45 = vlaneseq }
   0x2   :  { %364 = vmatpush3.bf16.msra.mxu0 %v402_v0  ;;  %371 = vmatprep.mubr.msk.bf16.mxu0 %vm434_vm0, %v433_v1  ;;  %v44_v3 = vld [vmem:[%s553_s1] sm:$0xff]  ;;  %v405_v8 = vld [vmem:[%s554_s2 + $0x18] sm:$0xff]   ;;  %v407_v13 = vld [vmem:[%s557_s5 + $0x8] sm:$0xff]   ;;  %vm241_vm3 = vcmask 130048   ;;  %v438_v43 = vmov 1966171168  }
   0x3   :  { %365 = vmatprep.subr.bf16.mxu0 %v433_v1  ;;  %379 = vmatprep.mubr.msk.bf16.mxu1 %vm434_vm0, %v433_v1  ;;  %v45_v6 = vcvt.s32.f32 %v44_v3  ;;  %v34_v9 = vld [vmem:[%s552_s0] sm:$0xff]  ;;  %v288_v44 = vunpack.c.l.s4 %v438_v43  ;;  %v291_v47 = vshrl.u32 %v290_v45, 7 }
   0x4   :  { %398 = vset.pattern.permute.xlu0 %v435_v5  ;;  %400 = vset.pattern.permute.xlu1 %v436_v7  ;;  %v35_v11 = vpack.c.bf16 %v34_v9, %v34_v9  ;;  %v406_v12 = vld [vmem:[%s557_s5] sm:$0xff]  }
   0x5   :  { %49 = vperm.xlu0 %398, %v45_v6   ;;  %138 = vperm.xlu1 %400, %v45_v6   ;;  %v335_v15 = vld [vmem:[%s555_s3] ss:$0 sm:$0xff]  ;;  %v341_v16 = vld [vmem:[%s555_s3 + $0x1] ss:$0 sm:$0xff]  ;;  %v342_v18 = vld [vmem:[%s555_s3 + $0x2] ss:$0 sm:$0xff]  ;;  %v289_v46 = vunpack.c.0.s8 %v288_v44 }
   0x6   :  { %366 = vmatpush3.bf16.msra.mxu0 %v403_v2  ;;  %376 = vmatpush3.bf16.msra.mxu1 %v406_v12  ;;  %v343_v29 = vld [vmem:[%s556_s4] ss:$0 sm:$0xff] }
   0x7   :  { %367 = vmatprep.subr.bf16.mxu0 %v433_v1  ;;  %377 = vmatprep.subr.bf16.mxu1 %v433_v1  ;;  %v408_v33 = vld [vmem:[%s559_s7] sm:$0xff]   ;;  %v292_v51 = vsub.s32 %v289_v46, %v291_v47 }
   0x8   :  { %v344_v35 = vld [vmem:[%s558_s6] ss:$0 sm:$0xff] }
   0x9   :  { %399 = vset.pattern.permute.xlu0 %v437_v10  ;;  %v348_v48 = vld [vmem:[%s560_s8] ss:$0 sm:$0xff] }
   0xa   :  { %368 = vmatpush3.bf16.msra.mxu0 %v404_v4  ;;  %127 = vperm.xlu0 %399, %v45_v6  }
   0xb   :  { %369 = vmatprep.subr.bf16.mxu0 %v433_v1  ;;  %378 = vmatpush3.bf16.msra.mxu1 %v407_v13 }
   0xc   :  { %383 = vmatprep.subr.bf16.mxu1 %v433_v1 }
   0xe   :  { %370 = vmatpush3.bf16.msra.mxu0 %v405_v8  ;;  %401 = vset.pattern.permute.xlu0 %v436_v7 }
  0x11   :  { %372 = vmatmul.mubr.msk.bf16.vlgmr.msra.gmra.mrb[0].mxu0 %vm81_vm1, %v35_v11 }
  0x84   :  { %v50_v14 = vpop.permute.xlu0 %49  ;;  %v139_v19 = vpop.permute.xlu1 %138 }
  0x85   :  { %v56_v20 = vmul.f32 %v335_v15, %v50_v14  ;;  %v145_v25 = vmul.f32 %v342_v18, %v139_v19 }
  0x89   :  { %v128_v17 = vpop.permute.xlu0 %127 }
  0x8a   :  { %v134_v21 = vmul.f32 %v341_v16, %v128_v17 }
  0xe4   :  { %v119_v22 = vpop.f32.mrb[0].mxu0 }
  0xe5   :  { %v120_v23 = vadd.f32 %v119_v22, %v56_v20  ;;  %v373_v24 = vpop.f32.mrb[1].mxu0 }
  0xe6   :  { %v122_v26 = vpop.f32.mrb[2].mxu0 }
  0xe7   :  { %v135_v27 = vadd.f32 %v134_v21, %v120_v23  ;;  %v374_v28 = vpop.f32.mrb[3].mxu0 }
  0xe9   :  { %v146_v30 = vadd.f32 %v145_v25, %v135_v27 }
  0xeb   :  { %v154_v31 = vadd.f32 %v343_v29, %v146_v30 }
  0xed   :  { %v155_v32 = vmax.f32 %v154_v31, 0.0 }
  0xef   :  { %v156_v34 = vpack.c.bf16 %v155_v32, %v155_v32 }
  0xf1   :  { %380 = vmatmul.mubr.msk.bf16.vlgmr.msra.gmra.mrb[0].mxu1 %vm180_vm2, %v156_v34 }
  0xf2   :  { %384 = vmatpush3.bf16.msra.mxu1 %v408_v33  ;;  %385 = vmatprep.mubr.msk.bf16.mxu1 %vm434_vm0, %v433_v1 }
 0x1c4   :  { %v218_v36 = vpop.f32.mrb[0].mxu1 }
 0x1c5   :  { %v219_v37 = vadd.f32 %v344_v35, %v218_v36  ;;  %v381_v38 = vpop.f32.mrb[1].mxu1 }
 0x1c6   :  { %v221_v39 = vpop.f32.mrb[2].mxu1 }
 0x1c7   :  { %v224_v40 = vmax.f32 %v219_v37, 0.0  ;;  %v382_v41 = vpop.f32.mrb[3].mxu1 }
 0x1c9   :  { %v225_v42 = vpack.c.bf16 %v224_v40, %v224_v40 }
 0x1cb   :  { %386 = vmatmul.mubr.msk.bf16.vlgmr.msra.gmra.mrb[4].mxu1 %vm241_vm3, %v225_v42 }
 0x29e   :  { %v279_v49 = vpop.f32.mrb[4].mxu1 }
 0x29f   :  { %v280_v50 = vadd.f32 %v348_v48, %v279_v49  ;;  %v387_v52 = vpop.f32.mrb[5].mxu1 }
 0x2a0   :  { %v282_v53 = vpop.f32.mrb[6].mxu1 }
 0x2a1   :  { %v285_v54 = vpack.c.bf16 %v280_v50, %v280_v50  ;;  %v388_v55 = vpop.f32.mrb[7].mxu1 }
 0x2a3   :  { %v293_v56 = vrot.slane %v285_v54, %v292_v51 }
 0x2a5   :  { %v294_v57 = vcombine.high %v293_v56, %v293_v56  ;;  %v301_v58 = vrot.slane %v293_v56, %v292_v51  ;;  %351 = vst.sshfl [vmem:[#allocation2] sm:$0x1 pattern:$0x73625140] %v293_v56 }
 0x2a7   :  { %v308_v59 = vrot.slane %v294_v57, %v292_v51  ;;  %v309_v60 = vcombine.high %v301_v58, %v301_v58  ;;  %352 = vst.sshfl [vmem:[#allocation2 + $0x1] sm:$0x1 pattern:$0x73625140] %v294_v57 }
 0x2a9   :  { %v310_v61 = vcombine.high %v308_v59, %v308_v59  ;;  %317 = vst [vmem:[#allocation2 + $0x2] sm:$0x1] %v309_v60 }
 0x2ab   :  { %318 = vst [vmem:[#allocation2 + $0x3] sm:$0x1] %v310_v61 }
 0x2ac   :  { %323 = vsyncadd [#allocation3], 48  ;;  %s439_s6 = smov [#allocation2]  }
 0x2ad   :  { %s324_s8 = sshll.u32 %s439_s6, 4  ;;  %s325_s8 = int_to_ptr.vmem [resolvable:$true] %s324_s8 }
 0x2ae   :  { %s409_s11 = scalar_lea.vmem %s325_s8, 16  ;;  %s413_s12 = scalar_lea.vmem %s325_s8, 64 }
 0x2af   :  { %p410_p0 = scmp.ne.s32.totalorder %s325_s8, %s409_s11  ;;  %p414_p1 = scmp.lt.s32.totalorder %s325_s8, %s325_s8 }
 0x2b0   :  { %p415_p2 = scmp.lt.s32.totalorder %s413_s12, %s409_s11 }
 0x2b2   :  { %p416_p3 = por %p415_p2, %p414_p1 }
 0x2b4   :  { %p417_p4 = pnand %p416_p3, %p410_p0 }
 0x2b6   :  { %420 = shalt.err (!%p417_p4)
}
 0x2b7   :  { %s421_s15 = scalar_lea.hbm %s561_s9, 16 }
 0x2b8   :  { %p422_p5 = scmp.ne.s32.totalorder %s561_s9, %s421_s15  ;;  %p425_p6 = scmp.lt.u32.totalorder %s421_s15, %s561_s9 }
 0x2ba   :  { %p427_p7 = pnand %p425_p6, %p422_p5 }
 0x2bc   :  { %430 = shalt.err (!%p427_p7)
}
 0x2bd   :  { %s440_s19 = smov 16   ;;  %s441_s20 = smov 1  }
 0x2be   :  { %330 = dma.vmem_to_hbm [thread:$0]  %s325_s8, 16, %s561_s9, [#allocation3], %s440_s19, %s440_s19, %s441_s20  }
 0x2bf   :  { %431 = dma.done.wait [#allocation3], 64  }
 0x2c0   :  { %432 = vsyncadd [#allocation3], 4294967232 }
 0x2c1   :  { %334 = vsyncpa [#allocation3], 1 }

</bundles_post_ra>
